<compile_context>
chip_gen: v7x
topology: tpu7x:2x2x1
jax: 0.10.0
libtpu: 0.0.40
codegen_flags: <defaults>
</compile_context>

<pallas_src>
import functools

import jax
import jax.numpy as jnp
from jax.experimental import pallas as pl
from jax.experimental.pallas import tpu as pltpu


# --------------------------------------------------------------------------- shared helper

def _channel_conv_gate2(w_ref, mean, padbuf_ref, k, pad, out_dtype):
    """k-wide cross-channel conv1d (zero padded, no bias) + sigmoid^2 on a pooled (C, 1)
    vector.  Implemented as k shifted multiply-adds through a small zero-padded VMEM
    scratch; weights are scalars read from SMEM.  No (C, C) band matrix, no MXU."""
    C = mean.shape[0]
    padbuf_ref[...] = jnp.zeros_like(padbuf_ref)
    padbuf_ref[pl.ds(pad, C), :] = mean
    conv = jnp.zeros((C, 1), jnp.float32)
    for j in range(k):                                   # k is tiny and static -> unrolled
        conv = conv + w_ref[j] * padbuf_ref[pl.ds(j, C), :]
    gate = 1.0 / (1.0 + jnp.exp(-conv))                  # sigmoid in f32 (safe at extremes)
    return (gate * gate).astype(out_dtype)               # gate applied twice


# --------------------------------------------------------------------------- kernels

def fused_eca_kernel(w_ref, x_ref, o_ref, padbuf_ref, *, inv_hw, k, pad):
    # w_ref: (k,) f32 SMEM; x_ref/o_ref: (1, C, HW); padbuf_ref: (C+2*pad, 1) f32 VMEM
    x = x_ref[0]                                                          # (C, HW) native dtype
    mean = jnp.sum(x.astype(jnp.float32), axis=-1, keepdims=True) * inv_hw
    g2 = _channel_conv_gate2(w_ref, mean, padbuf_ref, k, pad, x.dtype)    # (C, 1)
    o_ref[0] = x * g2                                                     # broadcast along lanes


def pool_gate_kernel(w_ref, x_ref, g2_ref, acc_ref, padbuf_ref, *,
                     inv_hw, hw, thw, k, pad, ragged):
    # w_ref: (k,) f32 SMEM; x_ref: (1, C, thw); g2_ref: (1, C, 1) f32
    # acc_ref: (C, acc_w) f32 scratch; padbuf_ref: (C+2*pad, 1) f32 scratch
    t = pl.program_id(1)
    C = x_ref.shape[1]

    @pl.when(t == 0)
    def _():
        acc_ref[...] = jnp.zeros_like(acc_ref)

    x = x_ref[0].astype(jnp.float32)                                      # (C, thw)
    if ragged:                                                            # mask OOB tail lanes
        lane = jax.lax.broadcasted_iota(jnp.int32, (C, thw), 1)
        x = jnp.where(t * thw + lane < hw, x, 0.0)

    if acc_ref.shape[1] == 128:
        # Lane-wide accumulator: per-tile accumulation is pure VPU adds of 128-lane
        # columns; the single cross-lane (XLU) reduce happens once in the epilogue.
        partial = x[:, 0:128]
        for i in range(1, thw // 128):
            partial = partial + x[:, i * 128:(i + 1) * 128]
        acc_ref[...] += partial
    else:
        acc_ref[...] += jnp.sum(x, axis=-1, keepdims=True)

    @pl.when(t == pl.num_programs(1) - 1)
    def _():
        mean = jnp.sum(acc_ref[...], axis=-1, keepdims=True) * inv_hw     # (C, 1)
        g2_ref[0] = _channel_conv_gate2(w_ref, mean, padbuf_ref, k, pad, g2_ref.dtype)


def apply_gate_kernel(x_ref, g2_ref, o_ref):
    # x_ref/o_ref: (1, C, thw); g2_ref: (1, C, 1) f32
    g = g2_ref[0].astype(o_ref.dtype)       # tiny (C, 1) cast; multiply stays in native dtype
    o_ref[0] = x_ref[0] * g


# --------------------------------------------------------------------------- wrapper

def _pick_hw_tile(hw, c, itemsize, budget_bytes):
    """Largest lane-aligned (multiple-of-128) spatial tile under the per-block VMEM budget.
    Ragged tails are handled in-kernel (cdiv grid + lane masking), so the tile need not
    divide hw."""
    cap = max(1, budget_bytes // max(1, c * itemsize))
    if hw <= cap:
        return hw
    if cap >= 128:
        return (cap // 128) * 128
    return min(hw, 128)   # degenerate (huge C): accept a slightly over-budget 128-lane tile


def eca_pallas(x, conv_w, *,
               fused_slab_limit_bytes=10 * 1024 * 1024,   # fused path if C*HW*itemsize <= this
               tile_budget_bytes=8 * 1024 * 1024,         # per-block budget for the streaming path
               vmem_limit_bytes=48 * 1024 * 1024):
    """x: (B, C, H, W); conv_w: (1, 1, k) -- the nn.Conv1d(1, 1, k, bias=False) weight."""
    B, C, H, W = x.shape
    HW = H * W
    K = conv_w.shape[-1]
    pad = (K - 1) // 2
    inv_hw = 1.0 / float(HW)

    x2 = x.reshape(B, C, HW)                       # free: merge contiguous trailing dims
    wvec = conv_w.reshape(K).astype(jnp.float32)   # (k,) weights -> SMEM

    w_spec = pl.BlockSpec(memory_space=pltpu.MemorySpace.SMEM)
    padbuf = pltpu.VMEM((C + 2 * pad, 1), jnp.float32)

    slab_bytes = C * HW * x.dtype.itemsize
    if slab_bytes <= fused_slab_limit_bytes:
        # ---- fused single pass: x is read once and written once; no gate2 round trip.
        out2 = pl.pallas_call(
            functools.partial(fused_eca_kernel, inv_hw=inv_hw, k=K, pad=pad),
            out_shape=jax.ShapeDtypeStruct((B, C, HW), x.dtype),
            grid=(B,),
            in_specs=[w_spec,
                      pl.BlockSpec((1, C, HW), lambda b: (b, 0, 0))],
            out_specs=pl.BlockSpec((1, C, HW), lambda b: (b, 0, 0)),
            scratch_shapes=[padbuf],
            compiler_params=pltpu.CompilerParams(
                dimension_semantics=("parallel",),
                vmem_limit_bytes=vmem_limit_bytes),
        )(wvec, x2)
        return out2.reshape(B, C, H, W)

    # ---- streaming two-pass path for slabs that do not fit in VMEM
    thw = _pick_hw_tile(HW, C, x.dtype.itemsize, tile_budget_bytes)
    T = pl.cdiv(HW, thw)
    ragged = (HW % thw) != 0
    acc_w = 128 if (thw % 128 == 0) else 1

    # pass 1: global average pool + cross-channel conv + sigmoid^2 -> gate^2 (B, C, 1)
    gate2 = pl.pallas_call(
        functools.partial(pool_gate_kernel, inv_hw=inv_hw, hw=HW, thw=thw,
                          k=K, pad=pad, ragged=ragged),
        out_shape=jax.ShapeDtypeStruct((B, C, 1), jnp.float32),
        grid=(B, T),
        in_specs=[w_spec,
                  pl.BlockSpec((1, C, thw), lambda b, t: (b, 0, t))],
        out_specs=pl.BlockSpec((1, C, 1), lambda b, t: (b, 0, 0)),
        scratch_shapes=[pltpu.VMEM((C, acc_w), jnp.float32), padbuf],
        compiler_params=pltpu.CompilerParams(
            dimension_semantics=("parallel", "arbitrary"),
            vmem_limit_bytes=vmem_limit_bytes),
    )(wvec, x2)

    # pass 2: out = x * gate^2 (lane-dense tiles, fully parallel grid)
    out2 = pl.pallas_call(
        apply_gate_kernel,
        out_shape=jax.ShapeDtypeStruct((B, C, HW), x.dtype),
        grid=(B, T),
        in_specs=[pl.BlockSpec((1, C, thw), lambda b, t: (b, 0, t)),
                  pl.BlockSpec((1, C, 1), lambda b, t: (b, 0, 0))],
        out_specs=pl.BlockSpec((1, C, thw), lambda b, t: (b, 0, t)),
        compiler_params=pltpu.CompilerParams(
            dimension_semantics=("parallel", "parallel"),
            vmem_limit_bytes=vmem_limit_bytes),
    )(x2, gate2)

    return out2.reshape(B, C, H, W)


# --------------------------------------------------------------------------- reference

def eca_reference(x, conv_w):
    """Pure-JAX reference matching the PyTorch eca_layer.forward (gate applied twice)."""
    B, C, H, W = x.shape
    K = conv_w.shape[-1]
    pad = (K - 1) // 2
    pooled = jnp.mean(x, axis=(2, 3))                              # (B, C)
    pz = jnp.pad(pooled, ((0, 0), (pad, pad)))                     # zero-padded channel axis
    w = conv_w.reshape(K)
    conv = sum(w[j] * pz[:, j:j + C] for j in range(K))            # (B, C)
    y = 1.0 / (1.0 + jnp.exp(-conv))                               # sigmoid
    return x * (y * y)[:, :, None, None]


if __name__ == "__main__":
    key = jax.random.PRNGKey(0)
    k_x, k_w, k_x2 = jax.random.split(key, 3)

    k_size = 3
    conv_w = jax.random.normal(k_w, (1, 1, k_size), dtype=jnp.float32) * 0.5

    # Case 1: small shape -> fused single-pass path.
    B, C, H, W = 2, 4, 16, 16
    x = jax.random.normal(k_x, (B, C, H, W), dtype=jnp.float32)
    out = jax.block_until_ready(eca_pallas(x, conv_w))
    ref = eca_reference(x, conv_w)
    assert out.shape == (B, C, H, W), out.shape
    assert jnp.allclose(out, ref, atol=1e-4, rtol=1e-4), "fused path mismatch vs reference"

    # Case 2: force the streaming two-pass path (ragged 128-lane tile, C not multiple of 8).
    B2, C2, H2, W2 = 2, 5, 18, 14    # HW = 252 -> tiles of 128 + ragged tail of 124
    x2 = jax.random.normal(k_x2, (B2, C2, H2, W2), dtype=jnp.float32)
    out2 = jax.block_until_ready(
        eca_pallas(x2, conv_w, fused_slab_limit_bytes=0, tile_budget_bytes=4 * 1024))
    ref2 = eca_reference(x2, conv_w)
    assert jnp.allclose(out2, ref2, atol=1e-4, rtol=1e-4), "streaming path mismatch vs reference"

    print("KERNEL_OK")
</pallas_src>

<mosaic_0001>
module attributes {stable_mosaic.version = 11 : i64} {
  func.func @fused_eca_kernel(%arg0: i32, %arg1: memref<3xf32, #tpu.memory_space<smem>>, %arg2: memref<1x4x256xf32, #tpu.memory_space<vmem>>, %arg3: memref<1x4x256xf32, #tpu.memory_space<vmem>>, %arg4: memref<6x1xf32, #tpu.memory_space<vmem>>) attributes {dimension_semantics = [#tpu.dimension_semantics<parallel>], iteration_bounds = array<i64: 2>, scalar_prefetch = 0 : i64, scratch_operands = 1 : i64, tpu.core_type = #tpu.core_type<tc>, window_params = [{transform_indices = @transform_0, window_bounds = array<i64: 3>}, {transform_indices = @transform_1, window_bounds = array<i64: 1, 4, 256>}, {transform_indices = @transform_2, window_bounds = array<i64: 1, 4, 256>}]} {
    %c0 = arith.constant 0 : index
    %c0_0 = arith.constant 0 : index
    %c0_1 = arith.constant 0 : index
    %0 = vector.load %arg2[%c0, %c0_0, %c0_1] : memref<1x4x256xf32, #tpu.memory_space<vmem>>, vector<1x4x256xf32>
    %1 = vector.shape_cast %0 : vector<1x4x256xf32> to vector<4x256xf32>
    %cst = arith.constant dense<0.000000e+00> : vector<4xf32>
    %2 = vector.multi_reduction <add>, %1, %cst [1] : vector<4x256xf32> to vector<4xf32>
    %3 = vector.shape_cast %2 : vector<4xf32> to vector<4x1xf32>
    %cst_2 = arith.constant 3.906250e-03 : f32
    %4 = vector.broadcast %cst_2 : f32 to vector<4x1xf32>
    %5 = arith.mulf %3, %4 : vector<4x1xf32>
    %cst_3 = arith.constant 0.000000e+00 : f32
    %6 = vector.broadcast %cst_3 : f32 to vector<6x1xf32>
    %c0_4 = arith.constant 0 : index
    %c0_5 = arith.constant 0 : index
    %7 = vector.load %arg4[%c0_4, %c0_5] : memref<6x1xf32, #tpu.memory_space<vmem>>, vector<6x1xf32>
    tpu.vector_store %arg4[%c0_4, %c0_5], %6 {strides = array<i32>} : memref<6x1xf32, #tpu.memory_space<vmem>>, vector<6x1xf32>,
    %c1 = arith.constant 1 : index
    %c0_6 = arith.constant 0 : index
    %8 = vector.load %arg4[%c1, %c0_6] : memref<6x1xf32, #tpu.memory_space<vmem>>, vector<4x1xf32>
    tpu.vector_store %arg4[%c1, %c0_6], %5 {strides = array<i32>} : memref<6x1xf32, #tpu.memory_space<vmem>>, vector<4x1xf32>,
    %cst_7 = arith.constant 0.000000e+00 : f32
    %9 = vector.broadcast %cst_7 : f32 to vector<4x1xf32>
    %c0_8 = arith.constant 0 : index
    %10 = memref.load %arg1[%c0_8] : memref<3xf32, #tpu.memory_space<smem>>
    %c0_9 = arith.constant 0 : index
    %c0_10 = arith.constant 0 : index
    %11 = vector.load %arg4[%c0_9, %c0_10] : memref<6x1xf32, #tpu.memory_space<vmem>>, vector<4x1xf32>
    %12 = vector.broadcast %10 : f32 to vector<4x1xf32>
    %13 = arith.mulf %12, %11 : vector<4x1xf32>
    %14 = arith.addf %9, %13 : vector<4x1xf32>
    %c1_11 = arith.constant 1 : index
    %15 = memref.load %arg1[%c1_11] : memref<3xf32, #tpu.memory_space<smem>>
    %c1_12 = arith.constant 1 : index
    %c0_13 = arith.constant 0 : index
    %16 = vector.load %arg4[%c1_12, %c0_13] : memref<6x1xf32, #tpu.memory_space<vmem>>, vector<4x1xf32>
    %17 = vector.broadcast %15 : f32 to vector<4x1xf32>
    %18 = arith.mulf %17, %16 : vector<4x1xf32>
    %19 = arith.addf %14, %18 : vector<4x1xf32>
    %c2 = arith.constant 2 : index
    %20 = memref.load %arg1[%c2] : memref<3xf32, #tpu.memory_space<smem>>
    %c2_14 = arith.constant 2 : index
    %c0_15 = arith.constant 0 : index
    %21 = vector.load %arg4[%c2_14, %c0_15] : memref<6x1xf32, #tpu.memory_space<vmem>>, vector<4x1xf32>
    %22 = vector.broadcast %20 : f32 to vector<4x1xf32>
    %23 = arith.mulf %22, %21 : vector<4x1xf32>
    %24 = arith.addf %19, %23 : vector<4x1xf32>
    %cst_16 = arith.constant 0.000000e+00 : f32
    %25 = vector.broadcast %cst_16 : f32 to vector<4x1xf32>
    %26 = arith.subf %25, %24 : vector<4x1xf32>
    %27 = math.exp %26 : vector<4x1xf32>
    %cst_17 = arith.constant 1.000000e+00 : f32
    %28 = vector.broadcast %cst_17 : f32 to vector<4x1xf32>
    %29 = arith.addf %28, %27 : vector<4x1xf32>
    %cst_18 = arith.constant 1.000000e+00 : f32
    %30 = vector.broadcast %cst_18 : f32 to vector<4x1xf32>
    %31 = arith.divf %30, %29 : vector<4x1xf32>
    %32 = arith.mulf %31, %31 : vector<4x1xf32>
    %33 = vector.broadcast %32 : vector<4x1xf32> to vector<4x256xf32>
    %34 = arith.mulf %1, %33 : vector<4x256xf32>
    %c0_19 = arith.constant 0 : index
    %c0_20 = arith.constant 0 : index
    %c0_21 = arith.constant 0 : index
    %35 = vector.load %arg3[%c0_19, %c0_20, %c0_21] : memref<1x4x256xf32, #tpu.memory_space<vmem>>, vector<1x4x256xf32>
    %36 = vector.shape_cast %35 : vector<1x4x256xf32> to vector<4x256xf32>
    %37 = vector.shape_cast %34 : vector<4x256xf32> to vector<1x4x256xf32>
    tpu.vector_store %arg3[%c0_19, %c0_20, %c0_21], %37 {strides = array<i32>} : memref<1x4x256xf32, #tpu.memory_space<vmem>>, vector<1x4x256xf32>,
    return
  }
  func.func @transform_0(%arg0: i32) -> i32 {
    %c0_i32 = arith.constant 0 : i32
    %c0_i32_0 = arith.constant 0 : i32
    return %c0_i32 : i32
  }
  func.func @transform_1(%arg0: i32) -> (i32, i32, i32) {
    %c0_i32 = arith.constant 0 : i32
    %c0_i32_0 = arith.constant 0 : i32
    %c0_i32_1 = arith.constant 0 : i32
    return %arg0, %c0_i32, %c0_i32_0 : i32, i32, i32
  }
  func.func @transform_2(%arg0: i32) -> (i32, i32, i32) {
    %c0_i32 = arith.constant 0 : i32
    %c0_i32_0 = arith.constant 0 : i32
    %c0_i32_1 = arith.constant 0 : i32
    return %arg0, %c0_i32, %c0_i32_0 : i32, i32, i32
  }
}

</mosaic_0001>

<bundles_post_ra>
// kernel: tpu_custom_call.1
= control target key start
LH: loop header
LB: loop body
LE: loop exit
PB: predicated region body
PF: predicated region fallthrough
CT: control target
= control target key end

     0   :  { %7 = vsyncpa [#allocation6], 0  ;;  %s751_s0 = inlined_call_operand.hbm [shape: f32[3], index: 0, kind: input, shape index: {}]   ;;  %s752_s1 = inlined_call_operand.hbm [shape: f32[2,4,256], index: 1, kind: input, shape index: {}]   ;;  %s753_s2 = inlined_call_operand.hbm [shape: f32[2,4,256], index: 2, kind: output, shape index: {}]  }
   0x1   :  { %8 = vsyncpa [#allocation4], 0 }
   0x2   :  { %10 = vsyncpa [#allocation4 + $0x1], 0 }
   0x3   :  { %11 = vsyncpa [#allocation5], 0 }
   0x4   :  { %13 = vsyncpa [#allocation5 + $0x1], 0  ;;  %s542_s9 = smov 0   ;;  %s544_s10 = smov 0  }
   0x5   :  { %s546_s11 = smov 0   ;;  %s548_s12 = smov 0  }
   0x6 LB: > { %s563_s13 = sadd.s32 4294967295, %s519_s12   ;;  %s320_s14 = sadd.s32 4294967294, %s519_s12   ;;  %s519_s12 = sphi %s548_s12, %s774_s12   ;;  %s515_s11 = sphi %s546_s11, %s773_s11   ;;  %s511_s10 = sphi %s544_s10, %s772_s10   ;;  %s507_s9 = sphi %s542_s9, %s771_s9  }
   0x7   : > { %p60_p0 = scmp.ne.s32.totalorder %s511_s10, %s507_s9  ;;  %p754_p1 = scmp.eq.s32.totalorder %s563_s13, 0 }
   0x8   : > { %p90_p3 = scmp.eq.s32.totalorder %s320_s14, 1  ;;  %p321_p5 = scmp.ge.s32.totalorder %s519_s12, 1 }
   0x9   : > { %p572_p4 = por %p754_p1, %p60_p0  ;;  %p97_p7 = scmp.lt.s32.totalorder %s519_s12, 3 }
   0xa   : > { %p577_p6 = por %p90_p3, %p60_p0  ;;  %s588_s18 = sadd.s32 1, %s519_s12  }
   0xb   : > { %s757_s15 = scalar_select %p572_p4, 1, 0 }
   0xc   : > { %s758_s16 = scalar_select %p577_p6, 1, 0 }
   0xd   : > { %p582_p8 = pnand %p321_p5, %p97_p7  ;;  %s44_s19 = ssub.s32 %s519_s12, %s588_s18 }
   0xe   : > { %s47_s20 = sadd.s32 1, %s515_s11  ;;  %p601_p12 = scmp.eq.s32.totalorder %s44_s19, 0 }
   0xf   : > { %p348_p10 = pneg %p582_p8  ;;  %p54_p13 = scmp.ne.s32.totalorder %s515_s11, %s511_s10 }
  0x10   : > { %p55_p0 = scmp.eq.s32.totalorder %s519_s12, 0  ;;  %p361_p3 = scmp.lt.s32.totalorder %s519_s12, 2 }
  0x11   : > { %p597_p11 = pnand %p348_p10, %p754_p1  ;;  %s406_s25 = scalar_lea.hbm %s751_s0, 16 }
  0x12   : > { %p407_p5 = scmp.ne.s32.totalorder %s751_s0, %s406_s25  ;;  %p413_p1 = scmp.lt.u32.totalorder %s406_s25, %s751_s0 }
  0x13   : > { %p408_p7 = pneg %p597_p11 }
  0x15   : > { %p409_p10 = pnand %p408_p7, %p407_p5 }
  0x17   : > { %p410_p9 = pneg %p409_p10 }
  0x19   : > { %p415_p2 = pnand %p413_p1, %p410_p9 }
  0x1b   : > { %418 = shalt.err (!%p415_p2)
}
  0x1c   : > { %s521_s30 = smov [#allocation3]   ;;  %p56_p1 = por %p55_p0, %p54_p13 }
  0x1d   : > { %351 = dma.hbm_to_smem (!%p597_p11), %s751_s0, 16, %s521_s30, [#allocation6]  }
  0x1e   : > { %s628_s5 = scalar_select %p601_p12, %s515_s11, %s47_s20  }
  0x1f   : > { %p762_p2 = scmp.eq.s32.totalorder %s563_s13, 1  ;;  %s119_s7 = sand.u32 1, %s515_s11  }
  0x20   : > { %s338_s8 = sshll.u32 %s519_s12, 7  ;;  %s324_s14 = sshll.u32 %s119_s7, 3 }
  0x21   : > { %p640_p9 = por %p762_p2, %p54_p13  ;;  %s649_s23 = scalar_lea.hbm %s752_s1, %s338_s8 }
  0x22   : > { %s123_s20 = scalar_lea.vmem [#allocation7], %s324_s14  ;;  %p653_p11 = pnand %p361_p3, %p56_p1 }
  0x23   : > { %s763_s6 = scalar_select %p640_p9, 1, 0 }
  0x24   : > { %s131_s22 = sshll.u32 %s123_s20, 4  ;;  %s120_s25 = scalar_lea.sflag [#allocation4], %s119_s7  ;;  %s657_s22 = int_to_ptr.vmem [resolvable:$true] %s131_s22 }
  0x25   : > { %s419_s26 = scalar_lea.hbm %s649_s23, 128  ;;  %p421_p13 = pneg %p653_p11 }
  0x26   : > { %p420_p12 = scmp.ne.s32.totalorder %s649_s23, %s419_s26  ;;  %s424_s29 = scalar_lea.hbm %s752_s1, 256 }
  0x27   : > { %p425_p3 = scmp.lt.u32.totalorder %s649_s23, %s752_s1  ;;  %p426_p7 = scmp.lt.u32.totalorder %s424_s29, %s419_s26 }
  0x28   : > { %p422_p0 = pnand %p421_p13, %p420_p12  ;;  %p428_p1 = scmp.lt.u32.totalorder %s419_s26, %s649_s23 }
  0x29   : > { %p427_p10 = por %p426_p7, %p425_p3 }
  0x2a   : > { %p423_p5 = pneg %p422_p0 }
  0x2b   : > { %p429_p2 = por %p428_p1, %p427_p10 }
  0x2d   : > { %p430_p6 = pnand %p429_p2, %p423_p5 }
  0x2f   : > { %433 = shalt.err (!%p430_p6)
}
  0x30   : > { %s434_s4 = scalar_lea.vmem %s657_s22, 128  ;;  %s522_s7 = smov [#allocation7]  }
  0x31   : > { %p435_p12 = scmp.ne.s32.totalorder %s657_s22, %s434_s4  ;;  %s439_s8 = sshll.u32 %s522_s7, 4  ;;  %s440_s8 = int_to_ptr.vmem [resolvable:$false] %s439_s8 }
  0x32   : > { %s441_s14 = scalar_lea.vmem %s440_s8, 256  ;;  %p442_p4 = scmp.lt.s32.totalorder %s657_s22, %s440_s8 }
  0x33   : > { %p437_p0 = pnand %p435_p12, %p421_p13  ;;  %p443_p3 = scmp.lt.s32.totalorder %s441_s14, %s434_s4 }
  0x35   : > { %p438_p9 = pneg %p437_p0  ;;  %p444_p7 = por %p443_p3, %p442_p4 }
  0x37   : > { %p445_p10 = pnand %p444_p7, %p438_p9 }
  0x39   : > { %448 = shalt.err (!%p445_p10)
}
  0x3a   : > { %355 = dma.hbm_to_vmem [thread:$0]  (!%p653_p11), %s649_s23, 128, %s657_s22, %s120_s25  }
  0x3b   : > { %140 = sbr.rel (%p582_p8) target bundleno = 414 (0x19e), region = 28  ;;  %p765_p6 = scmp.eq.s32.totalorder (!%p582_p8), %s563_s13, 0 }
  0x42   : > { %494 = dma.done.wait (%p765_p6), [#allocation6], 16   ;;  %p766_p13 = pmov %p765_p6 }
  0x43   : > { %s691_s19 = sand.u32 1, %s511_s10   ;;  %p767_p4 = scmp.ne.s32.totalorder %s757_s15, 0 }
  0x44   : > { %496 = vsyncadd (%p766_p13), [#allocation6], 4294967280  ;;  %s329_s21 = sshll.u32 %s691_s19, 3  ;;  %s147_s20 = scalar_lea.sflag [#allocation4], %s691_s19 }
  0x45   : > { %s150_s23 = scalar_lea.vmem [#allocation7], %s329_s21 }
  0x46   : > { %498 = dma.done.wait (%p767_p4), %s147_s20, 128  }
  0x47   : > { %500 = vsyncadd (%p767_p4), %s147_s20, 4294967168 }
  0x48   : > { %155 = sfence }
  0x49   : > { %v172_v0 = vld [vmem:[%s150_s23] sm:$0xff]  ;;  %vm176_vm0 = vcmask 1043456   ;;  %vm183_vm1 = vcmask 5120   ;;  %v523_v3 = vmov 0.0   ;;  %v524_v6 = vmov 0   ;;  %s187_s17 = sld [smem:[#allocation3]] }
  0x4a   : > { %v174_v1 = vcombine.high %v172_v0, %v172_v0  ;;  %v177_v2 = vsel %vm176_vm0, %v172_v0, 0.0  ;;  %184 = vst.msk [vmem:[#allocation2] sm:$0x3f] %vm183_vm1, %v523_v3  ;;  %400 = vset.pattern.permute.xlu0 %v524_v6  ;;  %vm185_vm2 = vcmask 3072   ;;  %s331_s22 = sld [smem:[#allocation3 + $0x1]]  ;;  %s332_s15 = sld [smem:[#allocation3 + $0x2]]  ;;  %v216_v28 = vlaneseq }
  0x4b   : > { %v525_v26 = vmov 839922192   ;;  %s339_s24 = sshll.u32 %s563_s13, 7  ;;  %s171_s25 = scalar_lea.vmem [#allocation8], %s329_s21 }
  0x4c   : > { %v178_v4 = vsel %vm176_vm0, %v174_v1, 0.0  ;;  %v214_v27 = vunpack.c.l.s4 %v525_v26  ;;  %v217_v30 = vshrl.u32 %v216_v28, 7  ;;  %s238_s26 = sshll.u32 %s171_s25, 4  ;;  %s707_s29 = scalar_lea.hbm %s753_s2, %s339_s24  ;;  %s709_s26 = int_to_ptr.vmem [resolvable:$true] %s238_s26 }
  0x4d   : > { %v179_v5 = vadd.f32 %v178_v4, %v177_v2  ;;  %s224_s30 = scalar_lea.sflag [#allocation5], %s691_s19  ;;  %s449_s3 = scalar_lea.vmem %s709_s26, 128 }
  0x4e   : > { %v215_v29 = vunpack.c.0.s8 %v214_v27  ;;  %p450_p8 = scmp.ne.s32.totalorder %s709_s26, %s449_s3  ;;  %p768_p9 = scmp.ne.s32.totalorder %s763_s6, 0 }
  0x4f   : > { %180 = vadd.xlane.f32.xlu0 %v179_v5  ;;  %v189_v9 = vstv %s187_s17  ;;  %s526_s13 = smov [#allocation8]  }
  0x50   : > { %v194_v10 = vstv %s331_s22  ;;  %v199_v14 = vstv %s332_s15  ;;  %v218_v31 = vsub.s32 %v215_v29, %v217_v30  ;;  %p451_p11 = pnand %p450_p8, %p768_p9  ;;  %s453_s4 = sshll.u32 %s526_s13, 4  ;;  %s454_s4 = int_to_ptr.vmem [resolvable:$false] %s453_s4 }
  0x51   : > { %s455_s7 = scalar_lea.vmem %s454_s4, 256  ;;  %p456_p1 = scmp.lt.s32.totalorder %s709_s26, %s454_s4 }
  0x52   : > { %p452_p5 = pneg %p451_p11  ;;  %p457_p2 = scmp.lt.s32.totalorder %s455_s7, %s449_s3 }
  0x54   : > { %p458_p12 = por %p457_p2, %p456_p1 }
  0x56   : > { %p459_p0 = pnand %p458_p12, %p452_p5 }
  0xdc   : > { %v181_v7 = vpop.xlane.xlu0 %180 }
  0xdd   : > { %v182_v8 = vmul.f32 0.00390625, %v181_v7 }
  0xdf   : > { %186 = vst.msk [vmem:[#allocation2 + $0x1] sm:$0xf] %vm185_vm2, %v182_v8 }
  0xe6   : > { %v188_v11 = vld [vmem:[#allocation2] sm:$0xf] }
  0xe7   : > { %v193_v12 = vld [vmem:[#allocation2 + $0x1] sm:$0xf]  ;;  %v190_v15 = vmul.f32 %v189_v9, %v188_v11 }
  0xe8   : > { %v198_v13 = vld [vmem:[#allocation2 + $0x2] sm:$0xf]  ;;  %v195_v16 = vmul.f32 %v194_v10, %v193_v12 }
  0xe9   : > { %v200_v18 = vmul.f32 %v199_v14, %v198_v13 }
  0xea   : > { %v196_v17 = vadd.f32 %v195_v16, %v190_v15 }
  0xec   : > { %v201_v19 = vadd.f32 %v200_v18, %v196_v17 }
  0xee   : > { %v202_v20 = vsub.f32 0.0, %v201_v19 }
  0xf0   : > { %v203_v21 = vmul.f32 1.442695, %v202_v20 }
  0xf2   : > { %402 = vpow2.f32 %v203_v21 }
  0xfc   : > { %v403_v22 = vpop.eup %402 }
  0xfd   : > { %v205_v23 = vadd.f32 1.0, %v403_v22 }
  0xff   : > { %404 = vrcp.f32 %v205_v23 }
 0x109   : > { %v405_v24 = vpop.eup %404 }
 0x10a   : > { %v208_v25 = vmul.f32 %v405_v24, %v405_v24 }
 0x10c   : > { %211 = vperm.xlu0 %400, %v208_v25  }
 0x18b   : > { %v212_v32 = vpop.permute.xlu0 %211 }
 0x18c   : > { %v219_v33 = vrot.slane %v212_v32, %v218_v31 }
 0x18e   : > { %v221_v34 = vmul.f32 %v219_v33, %v172_v0 }
 0x190   : > { %222 = vst [vmem:[%s171_s25] sm:$0xff] %v221_v34 }
 0x191   : > { %462 = shalt.err (!%p459_p0)
}
 0x192   : > { %s463_s8 = scalar_lea.hbm %s707_s29, 128  ;;  %s467_s21 = scalar_lea.hbm %s753_s2, 256 }
 0x193   : > { %p464_p3 = scmp.ne.s32.totalorder %s707_s29, %s463_s8  ;;  %p468_p6 = scmp.lt.u32.totalorder %s707_s29, %s753_s2 }
 0x194   : > { %p469_p13 = scmp.lt.u32.totalorder %s467_s21, %s463_s8  ;;  %p471_p8 = scmp.lt.u32.totalorder %s463_s8, %s707_s29 }
 0x195   : > { %p465_p7 = pnand %p464_p3, %p768_p9 }
 0x196   : > { %p470_p4 = por %p469_p13, %p468_p6 }
 0x197   : > { %p466_p10 = pneg %p465_p7 }
 0x198   : > { %p472_p11 = por %p471_p8, %p470_p4 }
 0x19a   : > { %p473_p5 = pnand %p472_p11, %p466_p10 }
 0x19c   : > { %476 = shalt.err (!%p473_p5)
}
 0x19d   : > { %346 = dma.vmem_to_hbm [thread:$0]  (%p768_p9), %s709_s26, 128, %s707_s29, %s224_s30  }
 0x19e PF: > { %s250_s17 = sand.u32 1, %s507_s9   ;;  %p769_p1 = scmp.ne.s32.totalorder %s758_s16, 0 }
 0x19f   : > { %p770_p2 = scmp.ge.s32.totalorder %s519_s12, 2  ;;  %s251_s22 = scalar_lea.sflag [#allocation5], %s250_s17 }
 0x1a1   : > { %p357_p12 = pnand %p770_p2, %p769_p1 }
 0x1a3   : > { %502 = dma.done.wait (!%p357_p12), %s251_s22, 128  }
 0x1a4   : > { %504 = vsyncadd (!%p357_p12), %s251_s22, 4294967168  ;;  %p16_p0 = scmp.ge.s32.totalorder %s588_s18, 4   ;;  %s771_s9 = smov %s511_s10 }
 0x1a5   : > { %s772_s10 = smov %s515_s11  ;;  %s773_s11 = smov %s628_s5 }
 0x1a6   : > { %s774_s12 = smov %s588_s18  ;;  %18 = sbr.rel (!%p16_p0) target bundleno = 6 (0x6), region = 78 }
 0x1ad   :  { %256 = vsyncpa [#allocation4], 1 }
 0x1ae   :  { %258 = vsyncpa [#allocation4 + $0x1], 1 }
 0x1af   :  { %259 = vsyncpa [#allocation5], 1 }
 0x1b0   :  { %261 = vsyncpa [#allocation5 + $0x1], 1 }
 0x1b1   :  { %262 = vsyncpa [#allocation6], 1 }
 0x1b2   :  { %264 = vsyncpa [#allocation6 + $0x1], 1 }

</bundles_post_ra>
